<compile_context>
chip_gen: v7x
topology: tpu7x:2x2x1
jax: 0.10.0
libtpu: 0.0.40
codegen_flags: <defaults>
</compile_context>

<pallas_src>
import jax
import jax.numpy as jnp
from jax import lax
from jax.experimental import pallas as pl
from jax.experimental.pallas import tpu as pltpu

# ----------------------------- model hyperparameters -----------------------------
B = 2          # batch
C_IN = 4       # image channels
H = W = 16     # spatial
FEAT = 32      # backbone feature width (fc input dim of the feature extractor)
N_COVAR = 4    # number of covariates
N_CLASSES = 1  # output classes
K9C = 9 * C_IN       # im2col contraction dim (36)

# ---- static lane-column offsets inside the (FEAT, 128) packed-parameter slab ----
_OFF_WCONV = 0     # rows :FEAT,     cols 0:36     conv weight (o, tap*C+c)
_OFF_BCONV = 40    # rows :FEAT,     col  40       conv bias (column)
_OFF_WFC = 48      # rows :n,        cols 48:80    image_features weight (PyTorch (n, FEAT))
_OFF_BFC = 80      # rows :n,        col  80       image_features bias (column)
_OFF_WATT = 88     # rows :2n,       cols 88:96    [w0_t ; w1_t] stacked (2n, 2n)
_OFF_BATT = 96     # rows :2n,       col  96       [b0 ; b1] (column)
_OFF_WA = 104      # rows :n,        cols 104:108  A_c blocks (n, n*n_classes)
_OFF_WU = 112      # rows :nc,       cols 112:116  u_c rows (n_classes, n)
_OFF_WV = 116      # rows :nc,       cols 116:120  v_c rows (n_classes, n)
_OFF_SB = 120      # rows :nc,       col  120      s_c + bias_c (column)


# ----------------------------------- kernel --------------------------------------
def covar_model_kernel(xcol_ref, pool_ref, cvt_ref, prm_ref, out_ref):
    f32 = jnp.float32
    n = cvt_ref.shape[0]              # n_covar
    nc = out_ref.shape[0]             # n_classes
    feat = prm_ref.shape[0]           # FEAT

    # Single load of the packed weight slab; static in-register slices below.
    prm = prm_ref[...]                                             # (FEAT, 128)
    wconv = prm[:, _OFF_WCONV:_OFF_WCONV + K9C]                    # (FEAT, 9*C_IN)
    bconv = prm[:, _OFF_BCONV:_OFF_BCONV + 1]                      # (FEAT, 1)
    wfc = prm[:n, _OFF_WFC:_OFF_WFC + feat]                        # (n, FEAT)
    bfc = prm[:n, _OFF_BFC:_OFF_BFC + 1]                           # (n, 1)
    watt = prm[:2 * n, _OFF_WATT:_OFF_WATT + 2 * n]                # (2n, 2n)
    batt = prm[:2 * n, _OFF_BATT:_OFF_BATT + 1]                    # (2n, 1)
    wa = prm[:n, _OFF_WA:_OFF_WA + n * nc]                         # (n, n*nc)
    wu = prm[:nc, _OFF_WU:_OFF_WU + n]                             # (nc, n)
    wv = prm[:nc, _OFF_WV:_OFF_WV + n]                             # (nc, n)
    sb = prm[:nc, _OFF_SB:_OFF_SB + 1]                             # (nc, 1)

    # ---- backbone: 3x3 conv as one lane-dense im2col matmul + bias + ReLU ----
    conv_t = jnp.maximum(
        jnp.dot(wconv, xcol_ref[...], preferred_element_type=f32) + bconv, 0.0)   # (FEAT, B*HW)

    # ---- global average pool on the MXU (pooling matrix) -> model(X), transposed ----
    pooled_t = jnp.dot(conv_t, pool_ref[...], preferred_element_type=f32)          # (FEAT, B)

    # ---- image_features fc + ReLU (column orientation) ----
    img_t = jnp.maximum(
        jnp.dot(wfc, pooled_t, preferred_element_type=f32) + bfc, 0.0)             # (n, B)
    cv_t = cvt_ref[...]                                                             # (n, B)

    # ---- attention: sigmoid(Linear(2n->2n packed)(cat(img, cv))); weight split == concat ----
    pre_t = (jnp.dot(watt[:, :n], img_t, preferred_element_type=f32)
             + jnp.dot(watt[:, n:], cv_t, preferred_element_type=f32)
             + batt)                                                                # (2n, B)
    a_t = jax.nn.sigmoid(pre_t)
    t0_t = a_t[:n, :] * img_t                                                       # (n, B)
    t1_t = a_t[n:, :] * cv_t                                                        # (n, B)

    # ---- bilinear head (append-1 + outer product + Linear, expanded algebraically) ----
    #   out[c,b] = t0^T A_c t1 + u_c.t0 + v_c.t1 + (s_c + bias_c)
    lin_t = (jnp.dot(wu, t0_t, preferred_element_type=f32)
             + jnp.dot(wv, t1_t, preferred_element_type=f32)
             + sb)                                                                  # (nc, B)
    ones_row = jnp.ones((1, n), f32)
    rows = []
    for c in range(nc):                                                             # tiny static loop
        m = jnp.dot(wa[:, c * n:(c + 1) * n], t1_t, preferred_element_type=f32)     # (n, B) = A_c @ t1
        rows.append(jnp.dot(ones_row, t0_t * m, preferred_element_type=f32))        # (1, B) via MXU
    bilin_t = rows[0] if nc == 1 else jnp.concatenate(rows, axis=0)                 # (nc, B)

    out_ref[...] = bilin_t + lin_t


# ------------------------------ one-time parameter packing ------------------------
def init_params(key):
    """Deterministic PyTorch-layout parameters (OIHW conv, (out,in) Linear weights)."""
    ks = jax.random.split(key, 10)

    def u(k, shape, fan_in):
        bound = 1.0 / jnp.sqrt(jnp.float32(fan_in))
        return jax.random.uniform(k, shape, jnp.float32, -bound, bound)

    sq = (N_COVAR + 1) ** 2
    return {
        "wconv_t": u(ks[0], (FEAT, C_IN, 3, 3), C_IN * 9),
        "bconv":   u(ks[1], (FEAT,), C_IN * 9),
        "wfc_t":   u(ks[2], (N_COVAR, FEAT), FEAT),          # image_features (deepcopy of fc)
        "bfc":     u(ks[3], (N_COVAR,), FEAT),
        "w0_t":    u(ks[4], (N_COVAR, 2 * N_COVAR), 2 * N_COVAR),
        "b0":      u(ks[5], (N_COVAR,), 2 * N_COVAR),
        "w1_t":    u(ks[6], (N_COVAR, 2 * N_COVAR), 2 * N_COVAR),
        "b1":      u(ks[7], (N_COVAR,), 2 * N_COVAR),
        "wc_t":    u(ks[8], (N_CLASSES, sq), sq),
        "bc":      u(ks[9], (N_CLASSES,), sq),
    }


def pack_params(p, batch_size):
    """Run ONCE at init: pack every weight into a single (FEAT, 128) f32 slab and build the
    constant global-average-pool matrix.  Nothing here runs in the per-call path."""
    n, nc, feat, hw = N_COVAR, N_CLASSES, FEAT, H * W
    prm = jnp.zeros((feat, 128), jnp.float32)

    # conv weight (o, (dy*3+dx)*C + c) and bias column
    wconv = p["wconv_t"].transpose(0, 2, 3, 1).reshape(feat, K9C)
    prm = prm.at[:, _OFF_WCONV:_OFF_WCONV + K9C].set(wconv)
    prm = prm.at[:, _OFF_BCONV].set(p["bconv"])

    # image_features fc (PyTorch (n, FEAT) layout used directly) and bias column
    prm = prm.at[:n, _OFF_WFC:_OFF_WFC + feat].set(p["wfc_t"])
    prm = prm.at[:n, _OFF_BFC].set(p["bfc"])

    # attention: rows [head0 ; head1]; columns [img-part | covar-part] (PyTorch layout)
    prm = prm.at[:2 * n, _OFF_WATT:_OFF_WATT + 2 * n].set(
        jnp.concatenate([p["w0_t"], p["w1_t"]], axis=0))
    prm = prm.at[:2 * n, _OFF_BATT].set(jnp.concatenate([p["b0"], p["b1"]]))

    # bilinear head split:  Wc[c].reshape(n+1,n+1) = [[A_c, u_c],[v_c, s_c]]
    wc3 = p["wc_t"].reshape(nc, n + 1, n + 1)
    prm = prm.at[:n, _OFF_WA:_OFF_WA + n * nc].set(
        jnp.transpose(wc3[:, :n, :n], (1, 0, 2)).reshape(n, nc * n))   # A_c blocks side by side
    prm = prm.at[:nc, _OFF_WU:_OFF_WU + n].set(wc3[:, :n, n])          # u_c rows
    prm = prm.at[:nc, _OFF_WV:_OFF_WV + n].set(wc3[:, n, :n])          # v_c rows
    prm = prm.at[:nc, _OFF_SB].set(wc3[:, n, n] + p["bc"])             # s_c + bias_c

    # block-"diagonal" pooling matrix, transposed: (B*HW, B), column b averages sample b.
    pool_t = jnp.kron(jnp.eye(batch_size, dtype=jnp.float32),
                      jnp.ones((hw, 1), jnp.float32)) / jnp.float32(hw)
    return prm, pool_t


# --------------------------------- forward (per call) -----------------------------
def _full_spec(a):
    zeros = (0,) * a.ndim
    return pl.BlockSpec(a.shape, lambda i, z=zeros: z)


@jax.jit
def covar_model_forward(X, covar, prm, pool_t):
    """X: (B, C_IN, H, W) NCHW, covar: (B, 1, N_COVAR).  prm/pool_t from pack_params().
    Returns (B, N_CLASSES)."""
    b = X.shape[0]
    hw = H * W

    # Lane-dense im2col slab (9*C_IN, B*H*W); the only device transpose is of the raw 16 KiB X.
    xt = jnp.transpose(X.astype(jnp.float32), (1, 0, 2, 3))            # (C, B, H, W)
    xtp = jnp.pad(xt, ((0, 0), (0, 0), (1, 1), (1, 1)))                # (C, B, H+2, W+2)
    taps = [xtp[:, :, dy:dy + H, dx:dx + W] for dy in range(3) for dx in range(3)]
    xcol_t = jnp.stack(taps, axis=0).reshape(K9C, b * hw)              # (36, B*HW)

    cv_t = covar[:, 0, :].astype(jnp.float32).T                        # covar.squeeze(1)^T: (n, B)

    inputs = (xcol_t, pool_t, cv_t, prm)
    grid_spec = pltpu.PrefetchScalarGridSpec(
        num_scalar_prefetch=0,
        grid=(1,),                                                     # single fused invocation
        in_specs=[_full_spec(a) for a in inputs],
        out_specs=pl.BlockSpec((N_CLASSES, b), lambda i: (0, 0)),
    )
    out_t = pl.pallas_call(
        covar_model_kernel,
        out_shape=jax.ShapeDtypeStruct((N_CLASSES, b), jnp.float32),
        grid_spec=grid_spec,
        compiler_params=pltpu.CompilerParams(dimension_semantics=("arbitrary",)),
    )(*inputs)
    return out_t.T                                                     # (B, N_CLASSES)


# ------------------------------ pure-JAX reference --------------------------------
def reference_forward(X, covar, p):
    conv = lax.conv_general_dilated(
        X, p["wconv_t"], (1, 1), "SAME",
        dimension_numbers=("NCHW", "OIHW", "NCHW")) + p["bconv"][None, :, None, None]
    conv = jnp.maximum(conv, 0.0)
    Z = jnp.mean(conv, axis=(2, 3))                                   # model(X): (B, FEAT)
    cv = covar[:, 0, :]
    img = jnp.maximum(Z @ p["wfc_t"].T + p["bfc"], 0.0)
    cat = jnp.concatenate([img, cv], axis=1)
    a0 = jax.nn.sigmoid(cat @ p["w0_t"].T + p["b0"])
    a1 = jax.nn.sigmoid(cat @ p["w1_t"].T + p["b1"])
    t0, t1 = a0 * img, a1 * cv
    ones = jnp.ones((X.shape[0], 1), jnp.float32)
    t0e = jnp.concatenate([t0, ones], axis=1)
    t1e = jnp.concatenate([t1, ones], axis=1)
    Zb = jnp.einsum("bi,bj->bij", t0e, t1e).reshape(X.shape[0], -1)
    return Zb @ p["wc_t"].T + p["bc"]


# ------------------------------------- main ----------------------------------------
if __name__ == "__main__":
    key = jax.random.PRNGKey(0)
    kx, kc, kp = jax.random.split(key, 3)
    X = jax.random.normal(kx, (B, C_IN, H, W), jnp.float32)       # NCHW, like PyTorch
    covar = jax.random.normal(kc, (B, 1, N_COVAR), jnp.float32)   # squeezed(1) in forward
    params = init_params(kp)

    # One-time packing (outside the jitted per-call path).
    prm, pool_t = pack_params(params, B)
    prm, pool_t = jax.block_until_ready((prm, pool_t))

    out = covar_model_forward(X, covar, prm, pool_t)
    out = jax.block_until_ready(out)

    ref = reference_forward(X, covar, params)
    assert out.shape == (B, N_CLASSES)
    assert jnp.allclose(out, ref, rtol=1e-4, atol=1e-4), (out, ref)
    print("KERNEL_OK")
</pallas_src>

<mosaic_0001>
module attributes {stable_mosaic.version = 11 : i64} {
  func.func @covar_model_kernel(%arg0: i32, %arg1: memref<36x512xf32, #tpu.memory_space<vmem>>, %arg2: memref<512x2xf32, #tpu.memory_space<vmem>>, %arg3: memref<4x2xf32, #tpu.memory_space<vmem>>, %arg4: memref<32x128xf32, #tpu.memory_space<vmem>>, %arg5: memref<1x2xf32, #tpu.memory_space<vmem>>) attributes {dimension_semantics = [#tpu.dimension_semantics<arbitrary>], iteration_bounds = array<i64: 1>, scalar_prefetch = 0 : i64, scratch_operands = 0 : i64, tpu.core_type = #tpu.core_type<tc>, window_params = [{pipeline_mode = #tpu.pipeline_mode<synchronous>, transform_indices = @transform_0, window_bounds = array<i64: 36, 512>}, {pipeline_mode = #tpu.pipeline_mode<synchronous>, transform_indices = @transform_1, window_bounds = array<i64: 512, 2>}, {pipeline_mode = #tpu.pipeline_mode<synchronous>, transform_indices = @transform_2, window_bounds = array<i64: 4, 2>}, {pipeline_mode = #tpu.pipeline_mode<synchronous>, transform_indices = @transform_3, window_bounds = array<i64: 32, 128>}, {pipeline_mode = #tpu.pipeline_mode<synchronous>, transform_indices = @transform_4, window_bounds = array<i64: 1, 2>}]} {
    %c0 = arith.constant 0 : index
    %c0_0 = arith.constant 0 : index
    %0 = vector.load %arg4[%c0, %c0_0] : memref<32x128xf32, #tpu.memory_space<vmem>>, vector<32x128xf32>
    %1 = vector.extract_strided_slice %0 {offsets = [0, 0], sizes = [32, 36], strides = [1, 1]} : vector<32x128xf32> to vector<32x36xf32>
    %2 = vector.extract_strided_slice %0 {offsets = [0, 40], sizes = [32, 1], strides = [1, 1]} : vector<32x128xf32> to vector<32x1xf32>
    %3 = vector.extract_strided_slice %0 {offsets = [0, 48], sizes = [4, 32], strides = [1, 1]} : vector<32x128xf32> to vector<4x32xf32>
    %4 = vector.extract_strided_slice %0 {offsets = [0, 80], sizes = [4, 1], strides = [1, 1]} : vector<32x128xf32> to vector<4x1xf32>
    %5 = vector.extract_strided_slice %0 {offsets = [0, 88], sizes = [8, 8], strides = [1, 1]} : vector<32x128xf32> to vector<8x8xf32>
    %6 = vector.extract_strided_slice %0 {offsets = [0, 96], sizes = [8, 1], strides = [1, 1]} : vector<32x128xf32> to vector<8x1xf32>
    %7 = vector.extract_strided_slice %0 {offsets = [0, 104], sizes = [4, 4], strides = [1, 1]} : vector<32x128xf32> to vector<4x4xf32>
    %8 = vector.extract_strided_slice %0 {offsets = [0, 112], sizes = [1, 4], strides = [1, 1]} : vector<32x128xf32> to vector<1x4xf32>
    %9 = vector.extract_strided_slice %0 {offsets = [0, 116], sizes = [1, 4], strides = [1, 1]} : vector<32x128xf32> to vector<1x4xf32>
    %10 = vector.extract_strided_slice %0 {offsets = [0, 120], sizes = [1, 1], strides = [1, 1]} : vector<32x128xf32> to vector<1x1xf32>
    %c0_1 = arith.constant 0 : index
    %c0_2 = arith.constant 0 : index
    %11 = vector.load %arg1[%c0_1, %c0_2] : memref<36x512xf32, #tpu.memory_space<vmem>>, vector<36x512xf32>
    %cst = arith.constant dense<0.000000e+00> : vector<32x512xf32>
    %12 = tpu.matmul %1, %11, %cst {dimension_numbers = #tpu.dot_dimension_numbers<[1], [0], [0], [1], [0, 0, 1, 1], [], []>} : vector<32x36xf32>, vector<36x512xf32>, vector<32x512xf32> -> vector<32x512xf32>
    %13 = vector.broadcast %2 : vector<32x1xf32> to vector<32x512xf32>
    %14 = arith.addf %12, %13 : vector<32x512xf32>
    %cst_3 = arith.constant 0.000000e+00 : f32
    %15 = vector.broadcast %cst_3 : f32 to vector<32x512xf32>
    %16 = arith.maximumf %14, %15 : vector<32x512xf32>
    %c0_4 = arith.constant 0 : index
    %c0_5 = arith.constant 0 : index
    %17 = vector.load %arg2[%c0_4, %c0_5] : memref<512x2xf32, #tpu.memory_space<vmem>>, vector<512x2xf32>
    %cst_6 = arith.constant dense<0.000000e+00> : vector<32x2xf32>
    %18 = tpu.matmul %16, %17, %cst_6 {dimension_numbers = #tpu.dot_dimension_numbers<[1], [0], [0], [1], [0, 0, 1, 1], [], []>} : vector<32x512xf32>, vector<512x2xf32>, vector<32x2xf32> -> vector<32x2xf32>
    %cst_7 = arith.constant dense<0.000000e+00> : vector<4x2xf32>
    %19 = tpu.matmul %3, %18, %cst_7 {dimension_numbers = #tpu.dot_dimension_numbers<[1], [0], [0], [1], [0, 0, 1, 1], [], []>} : vector<4x32xf32>, vector<32x2xf32>, vector<4x2xf32> -> vector<4x2xf32>
    %20 = vector.broadcast %4 : vector<4x1xf32> to vector<4x2xf32>
    %21 = arith.addf %19, %20 : vector<4x2xf32>
    %cst_8 = arith.constant 0.000000e+00 : f32
    %22 = vector.broadcast %cst_8 : f32 to vector<4x2xf32>
    %23 = arith.maximumf %21, %22 : vector<4x2xf32>
    %c0_9 = arith.constant 0 : index
    %c0_10 = arith.constant 0 : index
    %24 = vector.load %arg3[%c0_9, %c0_10] : memref<4x2xf32, #tpu.memory_space<vmem>>, vector<4x2xf32>
    %25 = vector.extract_strided_slice %5 {offsets = [0, 0], sizes = [8, 4], strides = [1, 1]} : vector<8x8xf32> to vector<8x4xf32>
    %cst_11 = arith.constant dense<0.000000e+00> : vector<8x2xf32>
    %26 = tpu.matmul %25, %23, %cst_11 {dimension_numbers = #tpu.dot_dimension_numbers<[1], [0], [0], [1], [0, 0, 1, 1], [], []>} : vector<8x4xf32>, vector<4x2xf32>, vector<8x2xf32> -> vector<8x2xf32>
    %27 = vector.extract_strided_slice %5 {offsets = [0, 4], sizes = [8, 4], strides = [1, 1]} : vector<8x8xf32> to vector<8x4xf32>
    %cst_12 = arith.constant dense<0.000000e+00> : vector<8x2xf32>
    %28 = tpu.matmul %27, %24, %cst_12 {dimension_numbers = #tpu.dot_dimension_numbers<[1], [0], [0], [1], [0, 0, 1, 1], [], []>} : vector<8x4xf32>, vector<4x2xf32>, vector<8x2xf32> -> vector<8x2xf32>
    %29 = arith.addf %26, %28 : vector<8x2xf32>
    %30 = vector.broadcast %6 : vector<8x1xf32> to vector<8x2xf32>
    %31 = arith.addf %29, %30 : vector<8x2xf32>
    %32 = arith.negf %31 : vector<8x2xf32>
    %33 = math.exp %32 : vector<8x2xf32>
    %cst_13 = arith.constant 1.000000e+00 : f32
    %34 = vector.broadcast %cst_13 : f32 to vector<8x2xf32>
    %35 = arith.addf %34, %33 : vector<8x2xf32>
    %36 = arith.divf %34, %35 : vector<8x2xf32>
    %37 = vector.extract_strided_slice %36 {offsets = [0, 0], sizes = [4, 2], strides = [1, 1]} : vector<8x2xf32> to vector<4x2xf32>
    %38 = arith.mulf %37, %23 : vector<4x2xf32>
    %39 = vector.extract_strided_slice %36 {offsets = [4, 0], sizes = [4, 2], strides = [1, 1]} : vector<8x2xf32> to vector<4x2xf32>
    %40 = arith.mulf %39, %24 : vector<4x2xf32>
    %cst_14 = arith.constant dense<0.000000e+00> : vector<1x2xf32>
    %41 = tpu.matmul %8, %38, %cst_14 {dimension_numbers = #tpu.dot_dimension_numbers<[1], [0], [0], [1], [0, 0, 1, 1], [], []>} : vector<1x4xf32>, vector<4x2xf32>, vector<1x2xf32> -> vector<1x2xf32>
    %cst_15 = arith.constant dense<0.000000e+00> : vector<1x2xf32>
    %42 = tpu.matmul %9, %40, %cst_15 {dimension_numbers = #tpu.dot_dimension_numbers<[1], [0], [0], [1], [0, 0, 1, 1], [], []>} : vector<1x4xf32>, vector<4x2xf32>, vector<1x2xf32> -> vector<1x2xf32>
    %43 = arith.addf %41, %42 : vector<1x2xf32>
    %44 = vector.broadcast %10 : vector<1x1xf32> to vector<1x2xf32>
    %45 = arith.addf %43, %44 : vector<1x2xf32>
    %cst_16 = arith.constant 1.000000e+00 : f32
    %46 = vector.broadcast %cst_16 : f32 to vector<1x4xf32>
    %cst_17 = arith.constant dense<0.000000e+00> : vector<4x2xf32>
    %47 = tpu.matmul %7, %40, %cst_17 {dimension_numbers = #tpu.dot_dimension_numbers<[1], [0], [0], [1], [0, 0, 1, 1], [], []>} : vector<4x4xf32>, vector<4x2xf32>, vector<4x2xf32> -> vector<4x2xf32>
    %48 = arith.mulf %38, %47 : vector<4x2xf32>
    %cst_18 = arith.constant dense<0.000000e+00> : vector<1x2xf32>
    %49 = tpu.matmul %46, %48, %cst_18 {dimension_numbers = #tpu.dot_dimension_numbers<[1], [0], [0], [1], [0, 0, 1, 1], [], []>} : vector<1x4xf32>, vector<4x2xf32>, vector<1x2xf32> -> vector<1x2xf32>
    %50 = arith.addf %49, %45 : vector<1x2xf32>
    %c0_19 = arith.constant 0 : index
    %c0_20 = arith.constant 0 : index
    %51 = vector.load %arg5[%c0_19, %c0_20] : memref<1x2xf32, #tpu.memory_space<vmem>>, vector<1x2xf32>
    tpu.vector_store %arg5[%c0_19, %c0_20], %50 {strides = array<i32>} : memref<1x2xf32, #tpu.memory_space<vmem>>, vector<1x2xf32>,
    return
  }
  func.func @transform_0(%arg0: i32) -> (i32, i32) {
    %c0_i32 = arith.constant 0 : i32
    %c0_i32_0 = arith.constant 0 : i32
    %c0_i32_1 = arith.constant 0 : i32
    return %c0_i32, %c0_i32_0 : i32, i32
  }
  func.func @transform_1(%arg0: i32) -> (i32, i32) {
    %c0_i32 = arith.constant 0 : i32
    %c0_i32_0 = arith.constant 0 : i32
    %c0_i32_1 = arith.constant 0 : i32
    return %c0_i32, %c0_i32_0 : i32, i32
  }
  func.func @transform_2(%arg0: i32) -> (i32, i32) {
    %c0_i32 = arith.constant 0 : i32
    %c0_i32_0 = arith.constant 0 : i32
    %c0_i32_1 = arith.constant 0 : i32
    return %c0_i32, %c0_i32_0 : i32, i32
  }
  func.func @transform_3(%arg0: i32) -> (i32, i32) {
    %c0_i32 = arith.constant 0 : i32
    %c0_i32_0 = arith.constant 0 : i32
    %c0_i32_1 = arith.constant 0 : i32
    return %c0_i32, %c0_i32_0 : i32, i32
  }
  func.func @transform_4(%arg0: i32) -> (i32, i32) {
    %c0_i32 = arith.constant 0 : i32
    %c0_i32_0 = arith.constant 0 : i32
    %c0_i32_1 = arith.constant 0 : i32
    return %c0_i32, %c0_i32_0 : i32, i32
  }
}

</mosaic_0001>

<bundles_post_ra>
// kernel: covar_model_forward.1
= control target key start
LH: loop header
LB: loop body
LE: loop exit
PB: predicated region body
PF: predicated region fallthrough
CT: control target
= control target key end

     0   :  { %v1402_v7 = vmov 0.0   ;;  %v1403_v13 = vmov 40   ;;  %vm71_vm0 = vcmask 1043456   ;;  %vm62_vm1 = vcmask 293888   ;;  %s1801_s0 = inlined_call_operand.vmem [shape: f32[36,512], index: 0, kind: input, shape index: {}]   ;;  %s1802_s1 = inlined_call_operand.vmem [shape: f32[512,2], index: 1, kind: input, shape index: {}]   ;;  %s1803_s2 = inlined_call_operand.vmem [shape: f32[4,2], index: 2, kind: input, shape index: {}]   ;;  %s1804_s3 = inlined_call_operand.vmem [shape: f32[32,128], index: 3, kind: input, shape index: {}]   ;;  %s1805_s4 = inlined_call_operand.hbm [shape: f32[1,2], index: 4, kind: output, shape index: {}]  }
   0x1   :  { %v23_v0 = vld [vmem:[%s1801_s0 + $0x8] sm:$0xff]  ;;  %v25_v2 = vld [vmem:[%s1801_s0 + $0x18] sm:$0xff]  ;;  %v22_v5 = vld [vmem:[%s1801_s0] sm:$0xff]  ;;  %148 = vmatprep.mubr.f32.mxu0 %v1402_v7  ;;  %237 = vmatprep.mubr.f32.mxu1 %v1402_v7 }
   0x2   :  { %v27_v1 = vld [vmem:[%s1801_s0 + $0x28] sm:$0xff]  ;;  %v29_v4 = vld [vmem:[%s1801_s0 + $0x38] sm:$0xff]  ;;  %v26_v6 = vld [vmem:[%s1801_s0 + $0x20] sm:$0xff]  ;;  %1368 = vset.pattern.permute.xlu0 %v1403_v13  ;;  %1369 = vset.pattern.permute.xlu1 %v1403_v13 }
   0x3   :  { %v1262_v3 = vpack.c.bf16 %v27_v1, %v23_v0  ;;  %v1270_v8 = vpack.c.bf16 %v29_v4, %v25_v2  ;;  %v1264_v9 = vpack.c.bf16 %v26_v6, %v22_v5  ;;  %v24_v10 = vld [vmem:[%s1801_s0 + $0x10] sm:$0xff]  ;;  %v31_v12 = vld [vmem:[%s1801_s0 + $0x48] sm:$0xff]  ;;  %v33_v16 = vld [vmem:[%s1801_s0 + $0x58] sm:$0xff] }
   0x4   :  { %v28_v11 = vld [vmem:[%s1801_s0 + $0x30] sm:$0xff]  ;;  %v35_v15 = vld [vmem:[%s1801_s0 + $0x68] sm:$0xff]  ;;  %v37_v17 = vld [vmem:[%s1801_s0 + $0x78] sm:$0xff] }
   0x5   :  { %1263 = vmatprep.subr.bf16.mxu0 %v1262_v3  ;;  %v1272_v14 = vpack.c.bf16 %v28_v11, %v24_v10  ;;  %1271 = vmatprep.subr.bf16.mxu1 %v1270_v8  ;;  %v1266_v18 = vpack.c.bf16 %v35_v15, %v31_v12  ;;  %v1274_v19 = vpack.c.bf16 %v37_v17, %v33_v16  ;;  %v30_v20 = vld [vmem:[%s1801_s0 + $0x40] sm:$0xff]  ;;  %v32_v22 = vld [vmem:[%s1801_s0 + $0x50] sm:$0xff]  ;;  %v39_v26 = vld [vmem:[%s1801_s0 + $0x88] sm:$0xf] }
   0x6   :  { %1265 = vmatpush1.bf16.msra.mxu0 %v1264_v9  ;;  %v34_v21 = vld [vmem:[%s1801_s0 + $0x60] sm:$0xff]  ;;  %v36_v24 = vld [vmem:[%s1801_s0 + $0x70] sm:$0xff]  ;;  %v41_v28 = vld [vmem:[%s1801_s0 + $0x98] sm:$0xf] }
   0x7   :  { %1273 = vmatpush1.bf16.msra.mxu1 %v1272_v14  ;;  %v1268_v23 = vpack.c.bf16 %v34_v21, %v30_v20  ;;  %1267 = vmatprep.subr.bf16.mxu0 %v1266_v18  ;;  %v1276_v25 = vpack.c.bf16 %v36_v24, %v32_v22  ;;  %v1498_v27 = vld [vmem:[%s1804_s3] sm:$0xff]  ;;  %v1509_v30 = vld [vmem:[%s1804_s3 + $0x10] sm:$0xff]  ;;  %v295_v33 = vld [vmem:[%s1802_s1 + $0x88] sm:$0xff] }
   0x8   :  { %1275 = vmatprep.subr.bf16.mxu1 %v1274_v19  ;;  %v38_v29 = vld [vmem:[%s1801_s0 + $0x80] sm:$0xf]  ;;  %44 = vperm.xlu0 %1368, %v1498_v27   ;;  %v40_v31 = vld [vmem:[%s1801_s0 + $0x90] sm:$0xf]  ;;  %v327_v35 = vld [vmem:[%s1802_s1 + $0x188] sm:$0xff] }
   0x9   :  { %54 = vperm.xlu1 %1369, %v1509_v30   ;;  %v294_v32 = vld [vmem:[%s1802_s1 + $0x80] sm:$0xff]  ;;  %v279_v37 = vld [vmem:[%s1802_s1 + $0x8] sm:$0xff]  ;;  %v1548_v41 = vld [vmem:[%s1804_s3 + $0x18] sm:$0xff] }
   0xa   :  { %1269 = vmatpush1.bf16.msra.mxu0 %v1268_v23  ;;  %v326_v34 = vld [vmem:[%s1802_s1 + $0x180] sm:$0xff]  ;;  %v19_v38 = vld [vmem:[%s1804_s3 + $0x8] sm:$0xff]  ;;  %v1278_v42 = vpack.c.bf16 %v295_v33, %v294_v32  ;;  %v296_v45 = vld [vmem:[%s1802_s1 + $0x90] sm:$0xff] }
   0xb   :  { %1277 = vmatpush1.bf16.msra.mxu1 %v1276_v25  ;;  %1090 = vmatprep.subr.msk.mxu0 %vm71_vm0, %v39_v26  ;;  %v278_v36 = vld [vmem:[%s1802_s1] sm:$0xff]  ;;  %v311_v40 = vld [vmem:[%s1802_s1 + $0x108] sm:$0xff]  ;;  %v1310_v43 = vpack.c.bf16 %v327_v35, %v326_v34  ;;  %v297_v46 = vld [vmem:[%s1802_s1 + $0x98] sm:$0xff] }
   0xc   :  { %1096 = vmatprep.subr.msk.mxu1 %vm71_vm0, %v41_v28  ;;  %v310_v39 = vld [vmem:[%s1802_s1 + $0x100] sm:$0xff]  ;;  %49 = vperm.xlu0 %1368, %v19_v38   ;;  %v1280_v44 = vpack.c.bf16 %v279_v37, %v278_v36  ;;  %v328_v47 = vld [vmem:[%s1802_s1 + $0x190] sm:$0xff]  ;;  %v329_v49 = vld [vmem:[%s1802_s1 + $0x198] sm:$0xff]  ;;  %v1282_v54 = vpack.c.bf16 %v297_v46, %v296_v45 }
   0xd   :  { %59 = vperm.xlu1 %1369, %v1548_v41   ;;  %v1312_v48 = vpack.c.bf16 %v311_v40, %v310_v39  ;;  %v280_v50 = vld [vmem:[%s1802_s1 + $0x10] sm:$0xff]  ;;  %v281_v51 = vld [vmem:[%s1802_s1 + $0x18] sm:$0xff]  ;;  %v1314_v55 = vpack.c.bf16 %v329_v49, %v328_v47  ;;  %v298_v57 = vld [vmem:[%s1802_s1 + $0xa0] sm:$0xff] }
   0xe   :  { %1091 = vmatpush1.msk.msra.mxu0 %vm71_vm0, %v38_v29  ;;  %v312_v52 = vld [vmem:[%s1802_s1 + $0x110] sm:$0xff]  ;;  %v313_v53 = vld [vmem:[%s1802_s1 + $0x118] sm:$0xff]  ;;  %v1284_v56 = vpack.c.bf16 %v281_v51, %v280_v50  ;;  %v299_v58 = vld [vmem:[%s1802_s1 + $0xa8] sm:$0xff] }
   0xf   :  { %1097 = vmatpush1.msk.msra.mxu1 %vm71_vm0, %v40_v31  ;;  %1092 = vmatmul.mubr.msk.f32.vlgmr.msra.gmra.mrb[0].mxu0 %vm62_vm1, %v1498_v27  ;;  %v330_v59 = vld [vmem:[%s1802_s1 + $0x1a0] sm:$0xff]  ;;  %v1316_v60 = vpack.c.bf16 %v313_v53, %v312_v52  ;;  %v331_v61 = vld [vmem:[%s1802_s1 + $0x1a8] sm:$0xff]  ;;  %v1286_v2 = vpack.c.bf16 %v299_v58, %v298_v57  ;;  %v300_v3 = vld [vmem:[%s1802_s1 + $0xb0] sm:$0xff] }
  0x10   :  { %1098 = vmatmul.mubr.msk.f32.vlgmr.msra.gmra.mrb[0].mxu1 %vm62_vm1, %v1498_v27  ;;  %154 = vmatprep.mubr.f32.mxu0 %v1402_v7  ;;  %v282_v62 = vld [vmem:[%s1802_s1 + $0x20] sm:$0xff]  ;;  %v283_v63 = vld [vmem:[%s1802_s1 + $0x28] sm:$0xff]  ;;  %v301_v4 = vld [vmem:[%s1802_s1 + $0xb8] sm:$0xff]  ;;  %v1318_v5 = vpack.c.bf16 %v331_v61, %v330_v59 }
  0x11   :  { %243 = vmatprep.mubr.f32.mxu1 %v1402_v7  ;;  %1279 = vmatprep.subr.bf16.mxu0 %v1278_v42  ;;  %v314_v0 = vld [vmem:[%s1802_s1 + $0x120] sm:$0xff]  ;;  %v315_v1 = vld [vmem:[%s1802_s1 + $0x128] sm:$0xff]  ;;  %v1288_v6 = vpack.c.bf16 %v283_v63, %v282_v62  ;;  %v332_v8 = vld [vmem:[%s1802_s1 + $0x1b0] sm:$0xff]  ;;  %v1290_v14 = vpack.c.bf16 %v301_v4, %v300_v3 }
  0x12   :  { %1311 = vmatprep.subr.bf16.mxu1 %v1310_v43  ;;  %1281 = vmatpush3.bf16.msra.mxu0 %v1280_v44  ;;  %v333_v9 = vld [vmem:[%s1802_s1 + $0x1b8] sm:$0xff]  ;;  %v1320_v10 = vpack.c.bf16 %v315_v1, %v314_v0  ;;  %v284_v11 = vld [vmem:[%s1802_s1 + $0x30] sm:$0xff]  ;;  %v302_v16 = vld [vmem:[%s1802_s1 + $0xc0] sm:$0xff] }
  0x13   :  { %1093 = vmatmul.mubr.msk.f32.gmra.mrb[2].mxu0 %vm62_vm1, %v19_v38  ;;  %1313 = vmatpush3.bf16.msra.mxu1 %v1312_v48  ;;  %v285_v12 = vld [vmem:[%s1802_s1 + $0x38] sm:$0xff]  ;;  %v316_v13 = vld [vmem:[%s1802_s1 + $0x130] sm:$0xff]  ;;  %v303_v17 = vld [vmem:[%s1802_s1 + $0xc8] sm:$0xff]  ;;  %v1322_v18 = vpack.c.bf16 %v333_v9, %v332_v8 }
  0x14   :  { %1099 = vmatmul.mubr.msk.f32.gmra.mrb[2].mxu1 %vm62_vm1, %v19_v38  ;;  %160 = vmatprep.mubr.f32.mxu0 %v1402_v7  ;;  %v317_v15 = vld [vmem:[%s1802_s1 + $0x138] sm:$0xff]  ;;  %v334_v19 = vld [vmem:[%s1802_s1 + $0x1c0] sm:$0xff]  ;;  %v335_v20 = vld [vmem:[%s1802_s1 + $0x1c8] sm:$0xff]  ;;  %v1292_v21 = vpack.c.bf16 %v285_v12, %v284_v11  ;;  %v1294_v24 = vpack.c.bf16 %v303_v17, %v302_v16 }
  0x15   :  { %249 = vmatprep.mubr.f32.mxu1 %v1402_v7  ;;  %1283 = vmatprep.subr.bf16.mxu0 %v1282_v54  ;;  %v286_v22 = vld [vmem:[%s1802_s1 + $0x40] sm:$0xff]  ;;  %v1324_v23 = vpack.c.bf16 %v317_v15, %v316_v13  ;;  %v287_v25 = vld [vmem:[%s1802_s1 + $0x48] sm:$0xff] }
  0x16   :  { %1315 = vmatprep.subr.bf16.mxu1 %v1314_v55  ;;  %1285 = vmatpush3.bf16.msra.mxu0 %v1284_v56  ;;  %v318_v26 = vld [vmem:[%s1802_s1 + $0x140] sm:$0xff] }
  0x17   :  { %1094 = vmatmul.mubr.msk.f32.gmra.mrb[4].mxu0 %vm62_vm1, %v1509_v30  ;;  %1317 = vmatpush3.bf16.msra.mxu1 %v1316_v60 }
  0x18   :  { %1100 = vmatmul.mubr.msk.f32.gmra.mrb[4].mxu1 %vm62_vm1, %v1509_v30  ;;  %166 = vmatprep.mubr.f32.mxu0 %v1402_v7 }
  0x19   :  { %255 = vmatprep.mubr.f32.mxu1 %v1402_v7  ;;  %1287 = vmatprep.subr.bf16.mxu0 %v1286_v2 }
  0x1a   :  { %1319 = vmatprep.subr.bf16.mxu1 %v1318_v5  ;;  %1289 = vmatpush3.bf16.msra.mxu0 %v1288_v6 }
  0x1b   :  { %1095 = vmatmul.mubr.msk.f32.gmra.mrb[6].mxu0 %vm62_vm1, %v1548_v41  ;;  %1321 = vmatpush3.bf16.msra.mxu1 %v1320_v10 }
  0x1c   :  { %9 = vsyncpa [#allocation3], 0  ;;  %1101 = vmatmul.mubr.msk.f32.gmra.mrb[6].mxu1 %vm62_vm1, %v1548_v41  ;;  %1291 = vmatprep.subr.bf16.mxu0 %v1290_v14  ;;  %v1326_v28 = vpack.c.bf16 %v335_v20, %v334_v19  ;;  %v319_v29 = vld [vmem:[%s1802_s1 + $0x148] sm:$0xff]  ;;  %v304_v30 = vld [vmem:[%s1802_s1 + $0xd0] sm:$0xff]  ;;  %v1296_v34 = vpack.c.bf16 %v287_v25, %v286_v22  ;;  %s1404_s26 = smov 80   ;;  %vm1406_vm2 = vmmov 0  }
  0x1d   :  { %v305_v31 = vld [vmem:[%s1802_s1 + $0xd8] sm:$0xff]  ;;  %1323 = vmatprep.subr.bf16.mxu1 %v1322_v18  ;;  %v336_v32 = vld [vmem:[%s1802_s1 + $0x1d0] sm:$0xff]  ;;  %v1328_v35 = vpack.c.bf16 %v319_v29, %v318_v26  ;;  %v306_v42 = vld [vmem:[%s1802_s1 + $0xe0] sm:$0xff]  ;;  %516 = vrot.lane.b32.xlu0 %v1498_v27, %s1404_s26  ;;  %s1408_s28 = smov 36   ;;  %s1409_s29 = smov 40   ;;  %vm518_vm3 = vcmask 261120  }
  0x1e   :  { %v337_v33 = vld [vmem:[%s1802_s1 + $0x1d8] sm:$0xff]  ;;  %1293 = vmatpush3.bf16.msra.mxu0 %v1292_v21  ;;  %v1298_v36 = vpack.c.bf16 %v305_v31, %v304_v30  ;;  %v288_v37 = vld [vmem:[%s1802_s1 + $0x50] sm:$0xff]  ;;  %v307_v43 = vld [vmem:[%s1802_s1 + $0xe8] sm:$0xff]  ;;  %vm595_vm4 = vcmask 31744   ;;  %s1412_s30 = smov 12   ;;  %s1413_s5 = smov 16  }
  0x1f   :  { %1325 = vmatpush3.bf16.msra.mxu1 %v1324_v23  ;;  %1295 = vmatprep.subr.bf16.mxu0 %v1294_v24  ;;  %v289_v38 = vld [vmem:[%s1802_s1 + $0x58] sm:$0xff]  ;;  %v320_v39 = vld [vmem:[%s1802_s1 + $0x150] sm:$0xff]  ;;  %v1330_v40 = vpack.c.bf16 %v337_v33, %v336_v32  ;;  %v338_v44 = vld [vmem:[%s1802_s1 + $0x1e0] sm:$0xff]  ;;  %v1302_v48 = vpack.c.bf16 %v307_v43, %v306_v42  ;;  %s1416_s3 = smov [#allocation2]   ;;  %vm1074_vm5 = vcmask 8192  }
  0x20   :  { %1327 = vmatprep.subr.bf16.mxu1 %v1326_v28  ;;  %v321_v41 = vld [vmem:[%s1802_s1 + $0x158] sm:$0xff]  ;;  %v339_v45 = vld [vmem:[%s1802_s1 + $0x1e8] sm:$0xff]  ;;  %v1300_v46 = vpack.c.bf16 %v289_v38, %v288_v37  ;;  %v290_v50 = vld [vmem:[%s1802_s1 + $0x60] sm:$0xff]  ;;  %s1082_s6 = sshll.u32 %s1416_s3, 4  ;;  %s1083_s6 = int_to_ptr.vmem [resolvable:$true] %s1082_s6 }
  0x21   :  { %v1332_v47 = vpack.c.bf16 %v321_v41, %v320_v39  ;;  %v1334_v49 = vpack.c.bf16 %v339_v45, %v338_v44  ;;  %v291_v51 = vld [vmem:[%s1802_s1 + $0x68] sm:$0xff]  ;;  %v322_v52 = vld [vmem:[%s1802_s1 + $0x160] sm:$0xff]  ;;  %v308_v56 = vld [vmem:[%s1802_s1 + $0xf0] sm:$0xff]  ;;  %593 = vrot.lane.b32.xlu0 %v1498_v27, %s1408_s28  ;;  %s1378_s7 = scalar_lea.vmem %s1083_s6, 16  ;;  %s1382_s8 = scalar_lea.vmem %s1083_s6, 32 }
  0x22   :  { %1297 = vmatpush3.bf16.msra.mxu0 %v1296_v34  ;;  %v1304_v53 = vpack.c.bf16 %v291_v51, %v290_v50  ;;  %v323_v54 = vld [vmem:[%s1802_s1 + $0x168] sm:$0xff]  ;;  %v309_v57 = vld [vmem:[%s1802_s1 + $0xf8] sm:$0xff]  ;;  %v340_v58 = vld [vmem:[%s1802_s1 + $0x1f0] sm:$0xff]  ;;  %p1379_p0 = scmp.ne.s32.totalorder %s1083_s6, %s1378_s7  ;;  %p1383_p1 = scmp.lt.s32.totalorder %s1083_s6, %s1083_s6 }
  0x23   :  { %1329 = vmatpush3.bf16.msra.mxu1 %v1328_v35  ;;  %1299 = vmatprep.subr.bf16.mxu0 %v1298_v36  ;;  %v1336_v55 = vpack.c.bf16 %v323_v54, %v322_v52  ;;  %v1306_v59 = vpack.c.bf16 %v309_v57, %v308_v56  ;;  %v341_v60 = vld [vmem:[%s1802_s1 + $0x1f8] sm:$0xff]  ;;  %v292_v61 = vld [vmem:[%s1802_s1 + $0x70] sm:$0xff]  ;;  %p1384_p2 = scmp.lt.s32.totalorder %s1382_s8, %s1378_s7 }
  0x24   :  { %1331 = vmatprep.subr.bf16.mxu1 %v1330_v40  ;;  %v293_v62 = vld [vmem:[%s1802_s1 + $0x78] sm:$0xff]  ;;  %v1338_v63 = vpack.c.bf16 %v341_v60, %v340_v58  ;;  %v324_v1 = vld [vmem:[%s1802_s1 + $0x170] sm:$0xff]  ;;  %v1405_v58 = vmov 0.0|0.0   ;;  %v1407_v60 = vmov 80  }
  0x25   :  { %v1308_v0 = vpack.c.bf16 %v293_v62, %v292_v61  ;;  %v325_v2 = vld [vmem:[%s1802_s1 + $0x178] sm:$0xff]  ;;  %1370 = vset.pattern.permute.xlu1 %v1407_v60  ;;  %v1415_v60 = vmov 1.0   ;;  %p1385_p3 = por %p1384_p2, %p1383_p1 }
  0x26   :  { %1301 = vmatpush3.bf16.msra.mxu0 %v1300_v46  ;;  %v1340_v3 = vpack.c.bf16 %v325_v2, %v324_v1  ;;  %513 = vperm.xlu1 %1370, %v1498_v27  }
  0x27   :  { %1333 = vmatpush3.bf16.msra.mxu1 %v1332_v47  ;;  %1303 = vmatprep.subr.bf16.mxu0 %v1302_v48  ;;  %p1386_p4 = pnand %p1385_p3, %p1379_p0 }
  0x28   :  { %1335 = vmatprep.subr.bf16.mxu1 %v1334_v49 }
  0x2a   :  { %1305 = vmatpush3.bf16.msra.mxu0 %v1304_v53  ;;  %671 = vrot.lane.b32.xlu1 %v1498_v27, %s1409_s29 }
  0x2b   :  { %1337 = vmatpush3.bf16.msra.mxu1 %v1336_v55  ;;  %1307 = vmatprep.subr.bf16.mxu0 %v1306_v59  ;;  %v1750_v59 = vld [vmem:[%s1803_s2] sm:$0xf]  ;;  %s1411_s2 = smov 24  }
  0x2c   :  { %1339 = vmatprep.subr.bf16.mxu1 %v1338_v63 }
  0x2e   :  { %1309 = vmatpush3.bf16.msra.mxu0 %v1308_v0  ;;  %923 = vrot.lane.b32.xlu1 %v1498_v27, %s1411_s2 }
  0x2f   :  { %1341 = vmatpush3.bf16.msra.mxu1 %v1340_v3  ;;  %1342 = vmatprep.subr.bf16.mxu0 %v1405_v58 }
  0x30   :  { %1232 = vmatprep.subr.mxu1 %v1402_v7 }
  0x32   :  { %763 = vrot.lane.b32.xlu1 %v1498_v27, %s1412_s30 }
  0x87   :  { %v45_v4 = vpop.permute.xlu0 %44 }
  0x88   :  { %v55_v24 = vpop.permute.xlu1 %54 }
  0x8b   :  { %v50_v14 = vpop.permute.xlu0 %49 }
  0x8c   :  { %v60_v41 = vpop.permute.xlu1 %59 }
  0xe2   :  { %v150_v5 = vpop.f32.mrb[0].mxu0 }
  0xe3   :  { %v151_v6 = vadd.f32 %v150_v5, %v45_v4  ;;  %v239_v8 = vpop.f32.mrb[0].mxu1  ;;  %v152_v9 = vpop.f32.mrb[1].mxu0 }
  0xe4   :  { %v240_v10 = vadd.f32 %v239_v8, %v45_v4  ;;  %v153_v11 = vadd.f32 %v152_v9, %v45_v4  ;;  %v241_v12 = vpop.f32.mrb[1].mxu1 }
  0xe5   :  { %v242_v13 = vadd.f32 %v241_v12, %v45_v4  ;;  %v262_v17 = vmax.f32 %v151_v6, 0.0 }
  0xe6   :  { %v263_v15 = vmax.f32 %v153_v11, 0.0  ;;  %v156_v16 = vpop.f32.mrb[2].mxu0  ;;  %v264_v22 = vmax.f32 %v240_v10, 0.0 }
  0xe7   :  { %v265_v18 = vmax.f32 %v242_v13, 0.0  ;;  %v157_v19 = vadd.f32 %v156_v16, %v50_v14  ;;  %v245_v20 = vpop.f32.mrb[2].mxu1  ;;  %v158_v21 = vpop.f32.mrb[3].mxu0 }
  0xe8   :  { %v246_v23 = vadd.f32 %v245_v20, %v50_v14  ;;  %v159_v25 = vadd.f32 %v158_v21, %v50_v14  ;;  %v247_v26 = vpop.f32.mrb[3].mxu1  ;;  %406 = vmatprep.mubr.f32.mxu0 %v263_v15 }
  0xe9   :  { %v248_v28 = vadd.f32 %v247_v26, %v50_v14  ;;  %491 = vmatprep.mubr.f32.mxu1 %v265_v18  ;;  %407 = vmatmul.mubr.f32.vlgmr.msra.gmra.mrb[8].mxu0 %v262_v17  ;;  %v266_v31 = vmax.f32 %v157_v19, 0.0 }
  0xea   :  { %v267_v29 = vmax.f32 %v159_v25, 0.0  ;;  %492 = vmatmul.mubr.f32.vlgmr.msra.gmra.mrb[8].mxu1 %v264_v22  ;;  %v162_v30 = vpop.f32.mrb[4].mxu0  ;;  %v268_v36 = vmax.f32 %v246_v23, 0.0 }
  0xeb   :  { %v269_v32 = vmax.f32 %v248_v28, 0.0  ;;  %v163_v33 = vadd.f32 %v162_v30, %v55_v24  ;;  %v251_v34 = vpop.f32.mrb[4].mxu1  ;;  %v164_v35 = vpop.f32.mrb[5].mxu0  ;;  %1233 = vmatpush3.msk.msra.mxu1 %vm71_vm0, %v1750_v59 }
  0xec   :  { %v252_v37 = vadd.f32 %v251_v34, %v55_v24  ;;  %v165_v38 = vadd.f32 %v164_v35, %v55_v24  ;;  %v253_v39 = vpop.f32.mrb[5].mxu1  ;;  %411 = vmatprep.mubr.f32.mxu0 %v267_v29  ;;  %1242 = vmatprep.subr.mxu1 %v1402_v7  ;;  %v517_v29 = vpop.permute.xlu0 %516 }
  0xed   :  { %v254_v40 = vadd.f32 %v253_v39, %v55_v24  ;;  %496 = vmatprep.mubr.f32.mxu1 %v269_v32  ;;  %412 = vmatmul.mubr.f32.gmra.mrb[10].mxu0 %v266_v31  ;;  %v270_v44 = vmax.f32 %v163_v33, 0.0  ;;  %v1410_v31 = vmov 96   ;;  %v514_v32 = vpop.permute.xlu1 %513 }
  0xee   :  { %v271_v42 = vmax.f32 %v165_v38, 0.0  ;;  %497 = vmatmul.mubr.f32.gmra.mrb[10].mxu1 %v268_v36  ;;  %v168_v43 = vpop.f32.mrb[6].mxu0  ;;  %v272_v49 = vmax.f32 %v252_v37, 0.0  ;;  %1371 = vset.pattern.permute.xlu0 %v1410_v31 }
  0xef   :  { %v273_v45 = vmax.f32 %v254_v40, 0.0  ;;  %v169_v46 = vadd.f32 %v168_v43, %v60_v41  ;;  %v257_v47 = vpop.f32.mrb[6].mxu1  ;;  %v170_v48 = vpop.f32.mrb[7].mxu0  ;;  %749 = vperm.xlu0 %1371, %v1498_v27  }
  0xf0   :  { %v258_v50 = vadd.f32 %v257_v47, %v60_v41  ;;  %v171_v51 = vadd.f32 %v170_v48, %v60_v41  ;;  %v259_v52 = vpop.f32.mrb[7].mxu1  ;;  %416 = vmatprep.mubr.f32.mxu0 %v271_v42  ;;  %v594_v30 = vpop.permute.xlu0 %593  ;;  %v760_v48 = vrot.slane %v1750_v59, 4 }
  0xf1   :  { %v260_v53 = vadd.f32 %v259_v52, %v60_v41  ;;  %501 = vmatprep.mubr.f32.mxu1 %v273_v45  ;;  %417 = vmatmul.mubr.f32.gmra.mrb[12].mxu0 %v270_v44  ;;  %v274_v55 = vmax.f32 %v169_v46, 0.0  ;;  %v672_v37 = vpop.permute.xlu1 %671 }
  0xf2   :  { %v275_v54 = vmax.f32 %v171_v51, 0.0  ;;  %502 = vmatmul.mubr.f32.gmra.mrb[12].mxu1 %v272_v49  ;;  %v276_v57 = vmax.f32 %v258_v50, 0.0 }
  0xf3   :  { %v277_v56 = vmax.f32 %v260_v53, 0.0  ;;  %841 = vrot.lane.b32.xlu0 %v1498_v27, %s1413_s5 }
  0xf4   :  { %421 = vmatprep.mubr.f32.mxu0 %v275_v54 }
  0xf5   :  { %506 = vmatprep.mubr.f32.mxu1 %v277_v56  ;;  %422 = vmatmul.mubr.f32.gmra.mrb[14].mxu0 %v274_v55  ;;  %v924_v49 = vpop.permute.xlu1 %923  ;;  %v1414_v56 = vmov 120  }
  0xf6   :  { %507 = vmatmul.mubr.f32.gmra.mrb[14].mxu1 %v276_v57  ;;  %1229 = vmatprep.mubr.msk.f32.mxu0 %vm1406_vm2, %v1402_v7 }
  0xf7   :  { %1234 = vmatprep.mubr.msk.f32.mxu1 %vm1406_vm2, %v1402_v7  ;;  %1372 = vset.pattern.permute.xlu1 %v1414_v56 }
  0xf8   :  { %1373 = vset.pattern.permute.xlu0 %v1414_v56  ;;  %919 = vperm.xlu1 %1372, %v1498_v27  }
  0xf9   :  { %v764_v53 = vpop.permute.xlu1 %763 }
  0xfa   :  { %1235 = vmatmul.mubr.msk.f32.vlgmr.msra.gmra.mrb[16].mxu1 %vm595_vm4, %v594_v30 }
  0xfb   :  { %1244 = vmatprep.mubr.msk.f32.mxu1 %vm1406_vm2, %v1402_v7 }
 0x16e   :  { %v750_v41 = vpop.permute.xlu0 %749 }
 0x172   :  { %v842_v55 = vpop.permute.xlu0 %841 }
 0x1bc   :  { %v1148_v61 = vpop.f32.mrb[8].mxu0 }
 0x1bd   :  { %v1192_v62 = vpop.f32.mrb[8].mxu1  ;;  %v1149_v63 = vpop.f32.mrb[9].mxu0 }
 0x1be   :  { %v1150_v0 = vadd.f32 %v1149_v63, %v1148_v61  ;;  %v1193_v1 = vpop.f32.mrb[9].mxu1  ;;  %v920_v61 = vpop.permute.xlu1 %919 }
 0x1bf   :  { %v1194_v2 = vadd.f32 %v1193_v1, %v1192_v62 }
 0x1c0   :  { %v1151_v3 = vpop.f32.mrb[10].mxu0 }
 0x1c1   :  { %v494_v4 = vadd.f32 %v1194_v2, %v1150_v0  ;;  %v1195_v5 = vpop.f32.mrb[10].mxu1  ;;  %v1152_v6 = vpop.f32.mrb[11].mxu0 }
 0x1c2   :  { %v1153_v8 = vadd.f32 %v1152_v6, %v1151_v3  ;;  %v1196_v9 = vpop.f32.mrb[11].mxu1 }
 0x1c3   :  { %v1197_v10 = vadd.f32 %v1196_v9, %v1195_v5 }
 0x1c4   :  { %v1154_v11 = vpop.f32.mrb[12].mxu0 }
 0x1c5   :  { %v499_v12 = vadd.f32 %v1197_v10, %v1153_v8  ;;  %v1198_v13 = vpop.f32.mrb[12].mxu1  ;;  %v1155_v14 = vpop.f32.mrb[13].mxu0 }
 0x1c6   :  { %v1156_v15 = vadd.f32 %v1155_v14, %v1154_v11  ;;  %v1199_v16 = vpop.f32.mrb[13].mxu1 }
 0x1c7   :  { %v1343_v17 = vpack.c.bf16 %v499_v12, %v494_v4  ;;  %v1200_v18 = vadd.f32 %v1199_v16, %v1198_v13 }
 0x1c8   :  { %v1157_v19 = vpop.f32.mrb[14].mxu0 }
 0x1c9   :  { %v504_v20 = vadd.f32 %v1200_v18, %v1156_v15  ;;  %v1201_v21 = vpop.f32.mrb[14].mxu1  ;;  %1344 = vmatpush3.bf16.msra.mxu0 %v1343_v17  ;;  %v1158_v22 = vpop.f32.mrb[15].mxu0 }
 0x1ca   :  { %v1159_v23 = vadd.f32 %v1158_v22, %v1157_v19  ;;  %v1202_v24 = vpop.f32.mrb[15].mxu1  ;;  %1345 = vmatprep.subr.bf16.mxu0 %v1405_v58 }
 0x1cb   :  { %v1203_v25 = vadd.f32 %v1202_v24, %v1201_v21 }
 0x1cd   :  { %v509_v26 = vadd.f32 %v1203_v25, %v1159_v23  ;;  %v667_v38 = vpop.f32.mrb[16].mxu1 }
 0x1ce   :  { %v1236_v39 = vpop.f32.mrb[17].mxu1 }
 0x1cf   :  { %v1346_v28 = vpack.c.bf16 %v509_v26, %v504_v20 }
 0x1d1   :  { %1347 = vmatpush3.bf16.msra.mxu0 %v1346_v28 }
 0x1d2   :  { %1237 = vmatprep.subr.mxu0 %v1402_v7 }
 0x1d4   :  { %1230 = vmatmul.mubr.msk.f32.vlgmr.msra.gmra.mrb[16].mxu0 %vm518_vm3, %v517_v29 }
 0x1d5   :  { %1239 = vmatprep.mubr.msk.f32.mxu0 %vm1406_vm2, %v1402_v7 }
 0x2a7   :  { %v587_v33 = vpop.f32.mrb[16].mxu0 }
 0x2a8   :  { %v588_v34 = vadd.f32 %v587_v33, %v514_v32  ;;  %v1231_v35 = vpop.f32.mrb[17].mxu0 }
 0x2aa   :  { %v591_v36 = vmax.f32 %v588_v34, 0.0 }
 0x2ac   :  { %1238 = vmatpush3.msk.msra.mxu0 %vm71_vm0, %v591_v36 }
 0x2ad   :  { %1240 = vmatmul.mubr.msk.f32.vlgmr.msra.gmra.mrb[18].mxu0 %vm595_vm4, %v672_v37  ;;  %1252 = vmatprep.subr.mxu0 %v1402_v7 }
 0x2ae   :  { %1254 = vmatprep.mubr.msk.f32.mxu0 %vm1406_vm2, %v1402_v7 }
 0x380   :  { %v744_v40 = vpop.f32.mrb[18].mxu0 }
 0x381   :  { %v745_v42 = vadd.f32 %v744_v40, %v667_v38  ;;  %v1241_v43 = vpop.f32.mrb[19].mxu0 }
 0x383   :  { %v752_v44 = vadd.f32 %v750_v41, %v745_v42 }
 0x385   :  { %v1107_v45 = vmul.f32 -1.442695, %v752_v44 }
 0x387   :  { %1374 = vpow2.f32 %v1107_v45 }
 0x391   :  { %v1375_v46 = vpop.eup %1374 }
 0x392   :  { %v756_v47 = vadd.f32 1.0, %v1375_v46 }
 0x394   :  { %1376 = vrcp.f32 %v756_v47 }
 0x39e   :  { %v1377_v50 = vpop.eup %1376 }
 0x39f   :  { %v762_v51 = vmul.f32 %v1377_v50, %v760_v48  ;;  %v759_v54 = vmul.f32 %v1377_v50, %v591_v36 }
 0x3a1   :  { %v766_v52 = vrot.slane %v762_v51, 4 }
 0x3a3   :  { %1243 = vmatpush3.msk.msra.mxu1 %vm71_vm0, %v766_v52  ;;  %1253 = vmatpush3.msk.msra.mxu0 %vm71_vm0, %v766_v52 }
 0x3a4   :  { %1247 = vmatprep.subr.mxu1 %v1402_v7  ;;  %1255 = vmatmul.mubr.msk.f32.vlgmr.msra.gmra.mrb[20].mxu0 %vm595_vm4, %v924_v49 }
 0x3a5   :  { %1245 = vmatmul.mubr.msk.f32.vlgmr.msra.gmra.mrb[18].mxu1 %vm595_vm4, %v764_v53 }
 0x3a6   :  { %1248 = vmatpush3.msk.msra.mxu1 %vm71_vm0, %v759_v54  ;;  %1249 = vmatprep.mubr.msk.f32.mxu1 %vm1406_vm2, %v1402_v7 }
 0x3a7   :  { %1257 = vmatprep.subr.mxu1 %v1402_v7 }
 0x3ad   :  { %1250 = vmatmul.mubr.msk.f32.vlgmr.msra.gmra.mrb[18].mxu1 %vm595_vm4, %v842_v55 }
 0x3ae   :  { %1259 = vmatprep.mubr.msk.f32.mxu1 %vm1406_vm2, %v1402_v7 }
 0x477   :  { %v993_v57 = vpop.f32.mrb[20].mxu0 }
 0x478   :  { %v997_v58 = vmul.f32 %v993_v57, %v759_v54  ;;  %v1256_v59 = vpop.f32.mrb[21].mxu0 }
 0x47a   :  { %1258 = vmatpush3.msk.msra.mxu1 %vm71_vm0, %v997_v58 }
 0x47b   :  { %1260 = vmatmul.mubr.msk.f32.vlgmr.msra.gmra.mrb[18].mxu1 %vm595_vm4, %v1415_v60 }
 0x54e   :  { %v1070_v62 = vpop.f32.mrb[18].mxu1 }
 0x54f   :  { %v1348_v63 = vadd.f32 %v1070_v62, %v920_v61  ;;  %v1261_v7 = vpop.f32.mrb[19].mxu1 }
 0x551   :  { %1075 = vst.msk [vmem:[#allocation2] sm:$0x1] %vm1074_vm5, %v1348_v63 }
 0x552   :  { %1389 = shalt.err (!%p1386_p4)
}
 0x553   :  { %s1390_s11 = scalar_lea.hbm %s1805_s4, 16 }
 0x554   :  { %p1391_p5 = scmp.ne.s32.totalorder %s1805_s4, %s1390_s11  ;;  %p1394_p6 = scmp.lt.u32.totalorder %s1390_s11, %s1805_s4 }
 0x556   :  { %p1396_p7 = pnand %p1394_p6, %p1391_p5 }
 0x558   :  { %1399 = shalt.err (!%p1396_p7)
}
 0x559   :  { %1085 = dma.vmem_to_hbm [thread:$0]  %s1083_s6, 16, %s1805_s4, [#allocation3]  }
 0x55a   :  { %1400 = dma.done.wait [#allocation3], 16  }
 0x55b   :  { %1401 = vsyncadd [#allocation3], 4294967280 }
 0x55c   :  { %1089 = vsyncpa [#allocation3], 1 }

</bundles_post_ra>
